<compile_context>
chip_gen: v5e
topology: v5e:2x2
jax: 0.10.0
libtpu: 0.0.40
codegen_flags: <defaults>
</compile_context>

<pallas_src>
import functools

import jax
import jax.numpy as jnp
from jax.experimental import pallas as pl
from jax.experimental.pallas import tpu as pltpu

INPUT_DIM = 4
LATENT_DIM = 2
HIDDEN_DIM = 128
H2 = HIDDEN_DIM // 2  # 64

ACT_WIDTH = 16   # lanes: [given(0:4) | generated(4:8) | eps(8:10) | pad(10:16)]
OUT_WIDTH = 128  # lanes: [recon(0:4) | mu(4:6) | logvar(6:8) | zeros(8:128)]

# Row offsets inside the packed weight slab. Every block is 8-row aligned and spans
# the full 128 lanes (zero-padded) so no sub-(8,128)-tile slab slice is ever taken.
R_W1 = 0        # (16, 128) encoder layer 1: rows 0:8 = w1 ([given|generated]), rows 8:16 = 0
R_W2 = 16       # (128,128) encoder layer 2: cols 0:64 = w2, cols 64:128 = 0
R_WH = 144      # (128,128) fused head: rows 0:64, cols 4:6 = wmu, cols 6:8 = wlv
R_WD1G = 272    # (16, 128) decoder layer 1 (given half): rows 0:4, cols 0:64 = wd1_given
R_WD1Z = 288    # (8,  128) decoder layer 1 (z half):     rows 0:2, cols 0:64 = wd1_z
R_WD2 = 296     # (128,128) decoder layer 2: rows 0:64 = wd2
R_WD3 = 424     # (128,128) decoder layer 3: cols 0:4 = wd3
W_ROWS = 552


def _cvae_kernel(acts_ref, w_ref, b_ref, out_ref):
    acts = acts_ref[...]                                      # (tb, 16)

    # ---------------- encoder ----------------
    # Full-slab operands: acts rows 8:16 hit zero weight rows, so eps/pad lanes are inert.
    h1 = jnp.dot(acts, w_ref[R_W1:R_W1 + ACT_WIDTH, :],
                 preferred_element_type=jnp.float32) + b_ref[0:1, :]
    h1 = jnp.maximum(h1, 0.0)                                 # (tb, 128)

    h2 = jnp.dot(h1, w_ref[R_W2:R_W2 + HIDDEN_DIM, :],
                 preferred_element_type=jnp.float32) + b_ref[1:2, :]
    h2 = jnp.maximum(h2, 0.0)                                 # (tb, 128); lanes 64:128 == 0

    # Fused head straight into output lanes: lanes 0:4 carry bd3 (used by the final sum),
    # lanes 4:6 = mu, lanes 6:8 = logvar, lanes 8:128 = 0.
    head = jnp.dot(h2, w_ref[R_WH:R_WH + HIDDEN_DIM, :],
                   preferred_element_type=jnp.float32) + b_ref[2:3, :]   # (tb, 128)
    mu = head[:, INPUT_DIM:INPUT_DIM + LATENT_DIM]
    logvar = head[:, INPUT_DIM + LATENT_DIM:INPUT_DIM + 2 * LATENT_DIM]

    # ---------------- reparameterize ----------------
    eps = acts[:, 2 * INPUT_DIM:2 * INPUT_DIM + LATENT_DIM]
    z = mu + eps * jnp.exp(0.5 * logvar)                      # (tb, 2)
    # Lane-pad z to 8 so the z-half weight is a full 8-row slab block (cheap, in-vreg).
    z8 = jnp.concatenate(
        [z, jnp.zeros((z.shape[0], 8 - LATENT_DIM), jnp.float32)], axis=-1)

    # ---------------- decoder ----------------
    # cat(z, given) @ Wd1 == z @ Wd1z + given @ Wd1g; the given half reuses `acts`
    # against a weight block whose non-given rows are zero.
    d1 = (jnp.dot(acts, w_ref[R_WD1G:R_WD1G + ACT_WIDTH, :],
                  preferred_element_type=jnp.float32)
          + jnp.dot(z8, w_ref[R_WD1Z:R_WD1Z + 8, :],
                    preferred_element_type=jnp.float32)
          + b_ref[3:4, :])
    d1 = jnp.maximum(d1, 0.0)                                 # (tb, 128); lanes 64:128 == 0

    d2 = jnp.dot(d1, w_ref[R_WD2:R_WD2 + HIDDEN_DIM, :],
                 preferred_element_type=jnp.float32) + b_ref[4:5, :]
    d2 = jnp.maximum(d2, 0.0)                                 # (tb, 128)

    # Final lane-dense slab: recon lands in lanes 0:4 (bias bd3 already carried in `head`),
    # mu/logvar in lanes 4:8, zeros elsewhere. Single unmasked full-vreg store.
    out_ref[...] = jnp.dot(d2, w_ref[R_WD3:R_WD3 + HIDDEN_DIM, :],
                           preferred_element_type=jnp.float32) + head


def _round_up(x, m):
    return -(-x // m) * m


def _choose_tiling(batch, tile_b):
    """Pick (tile rows, padded batch, grid steps). All trace-time Python ints."""
    if batch <= tile_b:
        tb = _round_up(max(batch, 1), 8)      # 8-aligned sublanes, no per-shape masking
        return tb, tb, 1
    nsteps = -(-batch // tile_b)
    if nsteps % 2:                            # even step count -> both v7x TCs get work
        nsteps += 1
    tb = _round_up(-(-batch // nsteps), 8)
    return tb, nsteps * tb, nsteps


@functools.partial(jax.jit, static_argnames=("tile_b",))
def cvae_forward(given_rect, generated_rect, eps, w_slab, b_slab, *, tile_b=4096):
    B = given_rect.shape[0]

    # Pack the three small activations into one lane-contiguous slab (single input DMA).
    acts = jnp.concatenate(
        [given_rect.astype(jnp.float32),
         generated_rect.astype(jnp.float32),
         eps.astype(jnp.float32),
         jnp.zeros((B, ACT_WIDTH - 2 * INPUT_DIM - LATENT_DIM), jnp.float32)],
        axis=1)

    tb, Bp, nsteps = _choose_tiling(B, tile_b)
    if Bp != B:
        acts = jnp.pad(acts, ((0, Bp - B), (0, 0)))

    out = pl.pallas_call(
        _cvae_kernel,
        out_shape=jax.ShapeDtypeStruct((Bp, OUT_WIDTH), jnp.float32),
        grid_spec=pltpu.PrefetchScalarGridSpec(
            num_scalar_prefetch=0,
            grid=(nsteps,),
            in_specs=[
                pl.BlockSpec((tb, ACT_WIDTH), lambda i: (i, 0)),
                pl.BlockSpec((W_ROWS, 128), lambda i: (0, 0)),   # weights stay VMEM-resident
                pl.BlockSpec((8, 128), lambda i: (0, 0)),        # biases stay VMEM-resident
            ],
            out_specs=pl.BlockSpec((tb, OUT_WIDTH), lambda i: (i, 0)),
        ),
        compiler_params=pltpu.CompilerParams(
            dimension_semantics=("parallel",)),
    )(acts, w_slab, b_slab)

    head = out[:B, 0:2 * INPUT_DIM]                       # slice the 8 useful lanes once
    recon = head[:, 0:INPUT_DIM]
    mu = head[:, INPUT_DIM:INPUT_DIM + LATENT_DIM]
    logvar = head[:, INPUT_DIM + LATENT_DIM:INPUT_DIM + 2 * LATENT_DIM]
    return recon, mu, logvar


def init_params(key):
    """Logical (unpacked) params mirroring PyTorch nn.Linear; weights stored (in, out)."""
    def linear(key, fan_in, fan_out):
        kw, kb = jax.random.split(key)
        bound = 1.0 / jnp.sqrt(fan_in)
        w = jax.random.uniform(kw, (fan_in, fan_out), jnp.float32, -bound, bound)
        b = jax.random.uniform(kb, (fan_out,), jnp.float32, -bound, bound)
        return w, b

    keys = jax.random.split(key, 7)
    w1, b1 = linear(keys[0], 2 * INPUT_DIM, HIDDEN_DIM)        # encoder[0]
    w2, b2 = linear(keys[1], HIDDEN_DIM, H2)                   # encoder[2]
    wmu, bmu = linear(keys[2], H2, LATENT_DIM)                 # fc_mu
    wlv, blv = linear(keys[3], H2, LATENT_DIM)                 # fc_logvar
    wd1, bd1 = linear(keys[4], LATENT_DIM + INPUT_DIM, H2)     # decoder[0]
    wd2, bd2 = linear(keys[5], H2, HIDDEN_DIM)                 # decoder[2]
    wd3, bd3 = linear(keys[6], HIDDEN_DIM, INPUT_DIM)          # decoder[4]
    return (w1, b1, w2, b2, wmu, bmu, wlv, blv, wd1, bd1, wd2, bd2, wd3, bd3)


def pack_params(params):
    """Pack logical params into two contiguous, fully (8,128)-tile-aligned slabs."""
    (w1, b1, w2, b2, wmu, bmu, wlv, blv, wd1, bd1, wd2, bd2, wd3, bd3) = params

    w_slab = jnp.zeros((W_ROWS, 128), jnp.float32)
    # Encoder layer 1: rows follow the acts lane layout ([given|generated]); eps/pad rows 0.
    w_slab = w_slab.at[R_W1:R_W1 + 2 * INPUT_DIM, :].set(w1)
    # Encoder layer 2 (cols 64:128 zero -> h2 lanes 64:128 stay zero).
    w_slab = w_slab.at[R_W2:R_W2 + HIDDEN_DIM, 0:H2].set(w2)
    # Fused head: mu -> output lanes 4:6, logvar -> lanes 6:8.
    w_slab = w_slab.at[R_WH:R_WH + H2,
                       INPUT_DIM:INPUT_DIM + LATENT_DIM].set(wmu)
    w_slab = w_slab.at[R_WH:R_WH + H2,
                       INPUT_DIM + LATENT_DIM:INPUT_DIM + 2 * LATENT_DIM].set(wlv)
    # Decoder layer 1: z half (rows 0:2 of wd1) and given half (rows 2:6), each padded
    # to a full 8/16-row, 128-lane block.
    w_slab = w_slab.at[R_WD1Z:R_WD1Z + LATENT_DIM, 0:H2].set(wd1[:LATENT_DIM])
    w_slab = w_slab.at[R_WD1G:R_WD1G + INPUT_DIM, 0:H2].set(wd1[LATENT_DIM:])
    # Decoder layers 2 & 3 (wd3 -> output lanes 0:4).
    w_slab = w_slab.at[R_WD2:R_WD2 + H2, :].set(wd2)
    w_slab = w_slab.at[R_WD3:R_WD3 + HIDDEN_DIM, 0:INPUT_DIM].set(wd3)

    b_slab = jnp.zeros((8, 128), jnp.float32)
    b_slab = b_slab.at[0, :].set(b1)
    b_slab = b_slab.at[1, 0:H2].set(b2)
    # Combined head/output bias row: bd3 in lanes 0:4, bmu in 4:6, blv in 6:8.
    b_slab = b_slab.at[2, 0:INPUT_DIM].set(bd3)
    b_slab = b_slab.at[2, INPUT_DIM:INPUT_DIM + LATENT_DIM].set(bmu)
    b_slab = b_slab.at[2, INPUT_DIM + LATENT_DIM:INPUT_DIM + 2 * LATENT_DIM].set(blv)
    b_slab = b_slab.at[3, 0:H2].set(bd1)
    b_slab = b_slab.at[4, :].set(bd2)
    return w_slab, b_slab


def cvae_reference(given_rect, generated_rect, eps, params):
    (w1, b1, w2, b2, wmu, bmu, wlv, blv, wd1, bd1, wd2, bd2, wd3, bd3) = params
    x = jnp.concatenate([given_rect, generated_rect], axis=1)
    h = jax.nn.relu(x @ w1 + b1)
    h = jax.nn.relu(h @ w2 + b2)
    mu = h @ wmu + bmu
    logvar = h @ wlv + blv
    z = mu + eps * jnp.exp(0.5 * logvar)
    d = jnp.concatenate([z, given_rect], axis=1)
    d = jax.nn.relu(d @ wd1 + bd1)
    d = jax.nn.relu(d @ wd2 + bd2)
    recon = d @ wd3 + bd3
    return recon, mu, logvar


if __name__ == "__main__":
    key = jax.random.PRNGKey(0)
    k_given, k_gen, k_eps, k_params = jax.random.split(key, 4)

    params = init_params(k_params)
    w_slab, b_slab = pack_params(params)

    # --- small batch (single-step path, B rounded up to a sublane multiple) ---
    B = 8
    given_rect = jax.random.normal(k_given, (B, INPUT_DIM), jnp.float32)
    generated_rect = jax.random.normal(k_gen, (B, INPUT_DIM), jnp.float32)
    # eps for the reparameterization is generated outside the kernel (deterministic).
    # TODO(synk): torch.randn_like inside forward has no in-kernel equivalent here; eps is an input.
    eps = jax.random.normal(k_eps, (B, LATENT_DIM), jnp.float32)

    recon, mu, logvar = cvae_forward(given_rect, generated_rect, eps, w_slab, b_slab)
    jax.block_until_ready((recon, mu, logvar))

    recon_r, mu_r, logvar_r = cvae_reference(given_rect, generated_rect, eps, params)
    assert jnp.allclose(recon, recon_r, atol=1e-5, rtol=1e-5)
    assert jnp.allclose(mu, mu_r, atol=1e-5, rtol=1e-5)
    assert jnp.allclose(logvar, logvar_r, atol=1e-5, rtol=1e-5)

    # --- larger batch with a small tile: exercises the even-count "parallel" grid + padding ---
    B2 = 1040
    kg2, kx2, ke2 = jax.random.split(jax.random.PRNGKey(1), 3)
    g2 = jax.random.normal(kg2, (B2, INPUT_DIM), jnp.float32)
    x2 = jax.random.normal(kx2, (B2, INPUT_DIM), jnp.float32)
    e2 = jax.random.normal(ke2, (B2, LATENT_DIM), jnp.float32)
    r2, m2, lv2 = cvae_forward(g2, x2, e2, w_slab, b_slab, tile_b=256)
    jax.block_until_ready((r2, m2, lv2))
    r2r, m2r, lv2r = cvae_reference(g2, x2, e2, params)
    assert jnp.allclose(r2, r2r, atol=1e-5, rtol=1e-5)
    assert jnp.allclose(m2, m2r, atol=1e-5, rtol=1e-5)
    assert jnp.allclose(lv2, lv2r, atol=1e-5, rtol=1e-5)

    print("KERNEL_OK")
</pallas_src>

<mosaic_0001>
module attributes {stable_mosaic.version = 11 : i64} {
  func.func @_cvae_kernel(%arg0: i32, %arg1: memref<8x16xf32, #tpu.memory_space<vmem>>, %arg2: memref<552x128xf32, #tpu.memory_space<vmem>>, %arg3: memref<8x128xf32, #tpu.memory_space<vmem>>, %arg4: memref<8x128xf32, #tpu.memory_space<vmem>>) attributes {dimension_semantics = [#tpu.dimension_semantics<parallel>], iteration_bounds = array<i64: 1>, scalar_prefetch = 0 : i64, scratch_operands = 0 : i64, tpu.core_type = #tpu.core_type<tc>, window_params = [{transform_indices = @transform_0, window_bounds = array<i64: 8, 16>}, {pipeline_mode = #tpu.pipeline_mode<synchronous>, transform_indices = @transform_1, window_bounds = array<i64: 552, 128>}, {pipeline_mode = #tpu.pipeline_mode<synchronous>, transform_indices = @transform_2, window_bounds = array<i64: 8, 128>}, {transform_indices = @transform_3, window_bounds = array<i64: 8, 128>}]} {
    %c0 = arith.constant 0 : index
    %c0_0 = arith.constant 0 : index
    %0 = vector.load %arg1[%c0, %c0_0] : memref<8x16xf32, #tpu.memory_space<vmem>>, vector<8x16xf32>
    %c0_1 = arith.constant 0 : index
    %c0_2 = arith.constant 0 : index
    %1 = vector.load %arg2[%c0_1, %c0_2] : memref<552x128xf32, #tpu.memory_space<vmem>>, vector<16x128xf32>
    %cst = arith.constant dense<0.000000e+00> : vector<8x128xf32>
    %2 = tpu.matmul %0, %1, %cst {dimension_numbers = #tpu.dot_dimension_numbers<[1], [0], [0], [1], [0, 0, 1, 1], [], []>} : vector<8x16xf32>, vector<16x128xf32>, vector<8x128xf32> -> vector<8x128xf32>
    %c0_3 = arith.constant 0 : index
    %c0_4 = arith.constant 0 : index
    %3 = vector.load %arg3[%c0_3, %c0_4] : memref<8x128xf32, #tpu.memory_space<vmem>>, vector<1x128xf32>
    %4 = vector.broadcast %3 : vector<1x128xf32> to vector<8x128xf32>
    %5 = arith.addf %2, %4 : vector<8x128xf32>
    %cst_5 = arith.constant 0.000000e+00 : f32
    %6 = vector.broadcast %cst_5 : f32 to vector<8x128xf32>
    %7 = arith.maximumf %5, %6 : vector<8x128xf32>
    %c16 = arith.constant 16 : index
    %c0_6 = arith.constant 0 : index
    %8 = vector.load %arg2[%c16, %c0_6] : memref<552x128xf32, #tpu.memory_space<vmem>>, vector<128x128xf32>
    %cst_7 = arith.constant dense<0.000000e+00> : vector<8x128xf32>
    %9 = tpu.matmul %7, %8, %cst_7 {dimension_numbers = #tpu.dot_dimension_numbers<[1], [0], [0], [1], [0, 0, 1, 1], [], []>} : vector<8x128xf32>, vector<128x128xf32>, vector<8x128xf32> -> vector<8x128xf32>
    %c1 = arith.constant 1 : index
    %c0_8 = arith.constant 0 : index
    %10 = vector.load %arg3[%c1, %c0_8] : memref<8x128xf32, #tpu.memory_space<vmem>>, vector<1x128xf32>
    %11 = vector.broadcast %10 : vector<1x128xf32> to vector<8x128xf32>
    %12 = arith.addf %9, %11 : vector<8x128xf32>
    %cst_9 = arith.constant 0.000000e+00 : f32
    %13 = vector.broadcast %cst_9 : f32 to vector<8x128xf32>
    %14 = arith.maximumf %12, %13 : vector<8x128xf32>
    %c144 = arith.constant 144 : index
    %c0_10 = arith.constant 0 : index
    %15 = vector.load %arg2[%c144, %c0_10] : memref<552x128xf32, #tpu.memory_space<vmem>>, vector<128x128xf32>
    %cst_11 = arith.constant dense<0.000000e+00> : vector<8x128xf32>
    %16 = tpu.matmul %14, %15, %cst_11 {dimension_numbers = #tpu.dot_dimension_numbers<[1], [0], [0], [1], [0, 0, 1, 1], [], []>} : vector<8x128xf32>, vector<128x128xf32>, vector<8x128xf32> -> vector<8x128xf32>
    %c2 = arith.constant 2 : index
    %c0_12 = arith.constant 0 : index
    %17 = vector.load %arg3[%c2, %c0_12] : memref<8x128xf32, #tpu.memory_space<vmem>>, vector<1x128xf32>
    %18 = vector.broadcast %17 : vector<1x128xf32> to vector<8x128xf32>
    %19 = arith.addf %16, %18 : vector<8x128xf32>
    %20 = vector.extract_strided_slice %19 {offsets = [0, 4], sizes = [8, 2], strides = [1, 1]} : vector<8x128xf32> to vector<8x2xf32>
    %21 = vector.extract_strided_slice %19 {offsets = [0, 6], sizes = [8, 2], strides = [1, 1]} : vector<8x128xf32> to vector<8x2xf32>
    %22 = vector.extract_strided_slice %0 {offsets = [0, 8], sizes = [8, 2], strides = [1, 1]} : vector<8x16xf32> to vector<8x2xf32>
    %cst_13 = arith.constant 5.000000e-01 : f32
    %23 = vector.broadcast %cst_13 : f32 to vector<8x2xf32>
    %24 = arith.mulf %23, %21 : vector<8x2xf32>
    %25 = math.exp %24 : vector<8x2xf32>
    %26 = arith.mulf %22, %25 : vector<8x2xf32>
    %27 = arith.addf %20, %26 : vector<8x2xf32>
    %cst_14 = arith.constant 0.000000e+00 : f32
    %28 = vector.broadcast %cst_14 : f32 to vector<8x6xf32>
    %29 = tpu.concatenate %27, %28 in 1 : vector<8x2xf32>, vector<8x6xf32> -> vector<8x8xf32>
    %c272 = arith.constant 272 : index
    %c0_15 = arith.constant 0 : index
    %30 = vector.load %arg2[%c272, %c0_15] : memref<552x128xf32, #tpu.memory_space<vmem>>, vector<16x128xf32>
    %cst_16 = arith.constant dense<0.000000e+00> : vector<8x128xf32>
    %31 = tpu.matmul %0, %30, %cst_16 {dimension_numbers = #tpu.dot_dimension_numbers<[1], [0], [0], [1], [0, 0, 1, 1], [], []>} : vector<8x16xf32>, vector<16x128xf32>, vector<8x128xf32> -> vector<8x128xf32>
    %c288 = arith.constant 288 : index
    %c0_17 = arith.constant 0 : index
    %32 = vector.load %arg2[%c288, %c0_17] : memref<552x128xf32, #tpu.memory_space<vmem>>, vector<8x128xf32>
    %cst_18 = arith.constant dense<0.000000e+00> : vector<8x128xf32>
    %33 = tpu.matmul %29, %32, %cst_18 {dimension_numbers = #tpu.dot_dimension_numbers<[1], [0], [0], [1], [0, 0, 1, 1], [], []>} : vector<8x8xf32>, vector<8x128xf32>, vector<8x128xf32> -> vector<8x128xf32>
    %34 = arith.addf %31, %33 : vector<8x128xf32>
    %c3 = arith.constant 3 : index
    %c0_19 = arith.constant 0 : index
    %35 = vector.load %arg3[%c3, %c0_19] : memref<8x128xf32, #tpu.memory_space<vmem>>, vector<1x128xf32>
    %36 = vector.broadcast %35 : vector<1x128xf32> to vector<8x128xf32>
    %37 = arith.addf %34, %36 : vector<8x128xf32>
    %cst_20 = arith.constant 0.000000e+00 : f32
    %38 = vector.broadcast %cst_20 : f32 to vector<8x128xf32>
    %39 = arith.maximumf %37, %38 : vector<8x128xf32>
    %c296 = arith.constant 296 : index
    %c0_21 = arith.constant 0 : index
    %40 = vector.load %arg2[%c296, %c0_21] : memref<552x128xf32, #tpu.memory_space<vmem>>, vector<128x128xf32>
    %cst_22 = arith.constant dense<0.000000e+00> : vector<8x128xf32>
    %41 = tpu.matmul %39, %40, %cst_22 {dimension_numbers = #tpu.dot_dimension_numbers<[1], [0], [0], [1], [0, 0, 1, 1], [], []>} : vector<8x128xf32>, vector<128x128xf32>, vector<8x128xf32> -> vector<8x128xf32>
    %c4 = arith.constant 4 : index
    %c0_23 = arith.constant 0 : index
    %42 = vector.load %arg3[%c4, %c0_23] : memref<8x128xf32, #tpu.memory_space<vmem>>, vector<1x128xf32>
    %43 = vector.broadcast %42 : vector<1x128xf32> to vector<8x128xf32>
    %44 = arith.addf %41, %43 : vector<8x128xf32>
    %cst_24 = arith.constant 0.000000e+00 : f32
    %45 = vector.broadcast %cst_24 : f32 to vector<8x128xf32>
    %46 = arith.maximumf %44, %45 : vector<8x128xf32>
    %c424 = arith.constant 424 : index
    %c0_25 = arith.constant 0 : index
    %47 = vector.load %arg2[%c424, %c0_25] : memref<552x128xf32, #tpu.memory_space<vmem>>, vector<128x128xf32>
    %cst_26 = arith.constant dense<0.000000e+00> : vector<8x128xf32>
    %48 = tpu.matmul %46, %47, %cst_26 {dimension_numbers = #tpu.dot_dimension_numbers<[1], [0], [0], [1], [0, 0, 1, 1], [], []>} : vector<8x128xf32>, vector<128x128xf32>, vector<8x128xf32> -> vector<8x128xf32>
    %49 = arith.addf %48, %19 : vector<8x128xf32>
    %c0_27 = arith.constant 0 : index
    %c0_28 = arith.constant 0 : index
    %50 = vector.load %arg4[%c0_27, %c0_28] : memref<8x128xf32, #tpu.memory_space<vmem>>, vector<8x128xf32>
    tpu.vector_store %arg4[%c0_27, %c0_28], %49 {strides = array<i32>} : memref<8x128xf32, #tpu.memory_space<vmem>>, vector<8x128xf32>,
    return
  }
  func.func @transform_0(%arg0: i32) -> (i32, i32) {
    %c0_i32 = arith.constant 0 : i32
    %c0_i32_0 = arith.constant 0 : i32
    return %arg0, %c0_i32 : i32, i32
  }
  func.func @transform_1(%arg0: i32) -> (i32, i32) {
    %c0_i32 = arith.constant 0 : i32
    %c0_i32_0 = arith.constant 0 : i32
    %c0_i32_1 = arith.constant 0 : i32
    return %c0_i32, %c0_i32_0 : i32, i32
  }
  func.func @transform_2(%arg0: i32) -> (i32, i32) {
    %c0_i32 = arith.constant 0 : i32
    %c0_i32_0 = arith.constant 0 : i32
    %c0_i32_1 = arith.constant 0 : i32
    return %c0_i32, %c0_i32_0 : i32, i32
  }
  func.func @transform_3(%arg0: i32) -> (i32, i32) {
    %c0_i32 = arith.constant 0 : i32
    %c0_i32_0 = arith.constant 0 : i32
    return %arg0, %c0_i32 : i32, i32
  }
}

</mosaic_0001>

<bundles_post_ra>
// kernel: cvae_forward.1
= control target key start
LH: loop header
LB: loop body
LE: loop exit
PB: predicated region body
PF: predicated region fallthrough
CT: control target
= control target key end

     0   :  { %8 = vsyncpa [#allocation3], 0  ;;  %s329_s15 = smov [#allocation2]   ;;  %s330_s17 = smov 128   ;;  %s390_s0 = inlined_call_operand.vmem [shape: f32[8,16], index: 0, kind: input, shape index: {}]   ;;  %s391_s1 = inlined_call_operand.hbm [shape: f32[552,128], index: 1, kind: input, shape index: {}]   ;;  %s392_s2 = inlined_call_operand.vmem [shape: f32[8,128], index: 2, kind: input, shape index: {}]   ;;  %s393_s3 = inlined_call_operand.vmem [shape: f32[8,128], index: 3, kind: output, shape index: {}]  }
   0x1   :  { %s15_s14 = sshll.u32 %s391_s1, 4  ;;  %s17_s16 = sshll.u32 %s329_s15, 4  ;;  %s16_s14 = int_to_ptr.hbm [resolvable:$true] %s15_s14  ;;  %s18_s16 = int_to_ptr.vmem [resolvable:$true] %s17_s16 }
   0x2   :  { %s331_s18 = smov 8  }
   0x3   :  { %23 = dma.hbm_to_vmem [thread:$0]  %s16_s14, 8832, %s18_s16, [#allocation3], %s330_s17, %s330_s17, %s331_s18  }
   0x4   :  { %327 = dma.done.wait [#allocation3], 8832  }
   0x5   :  { %328 = vsyncadd [#allocation3], 4294958464  ;;  %v32_v0 = vld [vmem:[#allocation2 + $0x8] sm:$0xff]  ;;  %v31_v1 = vld [vmem:[#allocation2] sm:$0xff]  ;;  %vm35_vm0 = vcmask 130048   ;;  %s332_s25 = smov 2  }
   0x6   :  { %53 = vmatpush.msra.mxu0 %v32_v0  ;;  %v360_v2 = vld [vmem:[%s390_s0] sm:$0xff]  ;;  %v75_v3 = vld [vmem:[#allocation2 + $0x88] sm:$0xff]  ;;  %v73_v5 = vld [vmem:[#allocation2 + $0x78] sm:$0xff]  ;;  %s333_s26 = smov 124   ;;  %vm154_vm1 = vcmask 15360   ;;  %vm159_vm2 = vcmask 64512  }
   0x7   :  { %v74_v4 = vld [vmem:[#allocation2 + $0x80] sm:$0xff]  ;;  %78 = vmatpush.msra.mxu1 %v75_v3  ;;  %v72_v6 = vld [vmem:[#allocation2 + $0x70] sm:$0xff]  ;;  %v71_v7 = vld [vmem:[#allocation2 + $0x68] sm:$0xff] }
   0x8   :  { %54 = vmatpush.msra.mxu0 %v31_v1  ;;  %v70_v8 = vld [vmem:[#allocation2 + $0x60] sm:$0xff]  ;;  %v69_v9 = vld [vmem:[#allocation2 + $0x58] sm:$0xff]  ;;  %v68_v10 = vld [vmem:[#allocation2 + $0x50] sm:$0xff] }
   0x9   :  { %288 = vmatmul.msk.f32.vlgmr.msra.gmra.mxu0 %vm35_vm0, %v360_v2  ;;  %79 = vmatpush.msra.mxu1 %v74_v4  ;;  %v67_v11 = vld [vmem:[#allocation2 + $0x48] sm:$0xff]  ;;  %v66_v12 = vld [vmem:[#allocation2 + $0x40] sm:$0xff]  ;;  %v65_v13 = vld [vmem:[#allocation2 + $0x38] sm:$0xff] }
   0xa   :  { %v64_v14 = vld [vmem:[#allocation2 + $0x30] sm:$0xff]  ;;  %v63_v15 = vld [vmem:[#allocation2 + $0x28] sm:$0xff]  ;;  %v62_v16 = vld [vmem:[#allocation2 + $0x20] sm:$0xff] }
   0xb   :  { %80 = vmatpush.msra.mxu1 %v73_v5  ;;  %v61_v17 = vld [vmem:[#allocation2 + $0x18] sm:$0xff]  ;;  %v60_v18 = vld [vmem:[#allocation2 + $0x10] sm:$0xff]  ;;  %v114_v19 = vld [vmem:[#allocation2 + $0x108] sm:$0xff] }
   0xc   :  { %v113_v20 = vld [vmem:[#allocation2 + $0x100] sm:$0xff]  ;;  %117 = vmatpush.msra.mxu2 %v114_v19  ;;  %v112_v21 = vld [vmem:[#allocation2 + $0xf8] sm:$0xff]  ;;  %v111_v22 = vld [vmem:[#allocation2 + $0xf0] sm:$0xff] }
   0xd   :  { %81 = vmatpush.msra.mxu1 %v72_v6  ;;  %v110_v23 = vld [vmem:[#allocation2 + $0xe8] sm:$0xff]  ;;  %v109_v24 = vld [vmem:[#allocation2 + $0xe0] sm:$0xff]  ;;  %v108_v25 = vld [vmem:[#allocation2 + $0xd8] sm:$0xff] }
   0xe   :  { %118 = vmatpush.msra.mxu2 %v113_v20  ;;  %v107_v26 = vld [vmem:[#allocation2 + $0xd0] sm:$0xff]  ;;  %v106_v27 = vld [vmem:[#allocation2 + $0xc8] sm:$0xff]  ;;  %v105_v28 = vld [vmem:[#allocation2 + $0xc0] sm:$0xff] }
   0xf   :  { %82 = vmatpush.msra.mxu1 %v71_v7  ;;  %v104_v29 = vld [vmem:[#allocation2 + $0xb8] sm:$0xff]  ;;  %v103_v30 = vld [vmem:[#allocation2 + $0xb0] sm:$0xff]  ;;  %v102_v31 = vld [vmem:[#allocation2 + $0xa8] sm:$0xff] }
  0x10   :  { %119 = vmatpush.msra.mxu2 %v112_v21  ;;  %v296_v32 = vld [vmem:[%s392_s2] ss:$0 sm:$0xff]  ;;  %v100_v37 = vld [vmem:[#allocation2 + $0x98] sm:$0xff]  ;;  %v99_v38 = vld [vmem:[#allocation2 + $0x90] sm:$0xff] }
  0x11   :  { %83 = vmatpush.msra.mxu1 %v70_v8  ;;  %v101_v36 = vld [vmem:[#allocation2 + $0xa0] sm:$0xff]  ;;  %v157_v51 = vld [vmem:[#allocation2 + $0x118] sm:$0xff]  ;;  %v156_v53 = vld [vmem:[#allocation2 + $0x110] sm:$0xff] }
  0x12   :  { %120 = vmatpush.msra.mxu2 %v111_v22  ;;  %v297_v39 = vld [vmem:[%s392_s2 + $0x1] ss:$0 sm:$0xff]  ;;  %v298_v43 = vld [vmem:[%s392_s2 + $0x2] ss:$0 sm:$0xff]  ;;  %197 = vmatpush.msra.mxu3 %v157_v51  ;;  %v221_v57 = vld [vmem:[#allocation2 + $0x198] sm:$0xff] }
  0x13   :  { %84 = vmatpush.msra.mxu1 %v69_v9  ;;  %v158_v52 = vld [vmem:[#allocation2 + $0x120] sm:$0xff]  ;;  %v220_v58 = vld [vmem:[#allocation2 + $0x190] sm:$0xff]  ;;  %v219_v59 = vld [vmem:[#allocation2 + $0x188] sm:$0xff] }
  0x14   :  { %121 = vmatpush.msra.mxu2 %v110_v23  ;;  %198 = vmatpush.msra.mxu3 %v156_v53  ;;  %v222_v56 = vld [vmem:[#allocation2 + $0x1a0] sm:$0xff]  ;;  %v217_v61 = vld [vmem:[#allocation2 + $0x178] sm:$0xff]  ;;  %v216_v62 = vld [vmem:[#allocation2 + $0x170] sm:$0xff] }
  0x15   :  { %85 = vmatpush.msra.mxu1 %v68_v10  ;;  %290 = vmatmul.msk.f32.vlgmr.msra.gmra.mxu3 %vm35_vm0, %v360_v2  ;;  %v218_v60 = vld [vmem:[#allocation2 + $0x180] sm:$0xff]  ;;  %v215_v63 = vld [vmem:[#allocation2 + $0x168] sm:$0xff]  ;;  %v213_v1 = vld [vmem:[#allocation2 + $0x158] sm:$0xff] }
  0x16   :  { %122 = vmatpush.msra.mxu2 %v109_v24  ;;  %225 = vmatpush.msrb.mxu0 %v222_v56  ;;  %v214_v0 = vld [vmem:[#allocation2 + $0x160] sm:$0xff]  ;;  %v211_v3 = vld [vmem:[#allocation2 + $0x148] sm:$0xff]  ;;  %v209_v7 = vld [vmem:[#allocation2 + $0x138] sm:$0xff] }
  0x17   :  { %86 = vmatpush.msra.mxu1 %v67_v11  ;;  %v210_v6 = vld [vmem:[#allocation2 + $0x140] sm:$0xff]  ;;  %v208_v8 = vld [vmem:[#allocation2 + $0x130] sm:$0xff]  ;;  %v207_v9 = vld [vmem:[#allocation2 + $0x128] sm:$0xff] }
  0x18   :  { %123 = vmatpush.msra.mxu2 %v108_v25  ;;  %226 = vmatpush.msrb.mxu0 %v221_v57  ;;  %v261_v10 = vld [vmem:[#allocation2 + $0x220] sm:$0xff]  ;;  %v260_v11 = vld [vmem:[#allocation2 + $0x218] sm:$0xff]  ;;  %v251_v20 = vld [vmem:[#allocation2 + $0x1d0] sm:$0xff] }
  0x19   :  { %87 = vmatpush.msra.mxu1 %v66_v12  ;;  %262 = vmatpush.msrb.mxu3 %v261_v10  ;;  %v259_v12 = vld [vmem:[#allocation2 + $0x210] sm:$0xff]  ;;  %v252_v19 = vld [vmem:[#allocation2 + $0x1d8] sm:$0xff]  ;;  %v250_v21 = vld [vmem:[#allocation2 + $0x1c8] sm:$0xff] }
  0x1a   :  { %124 = vmatpush.msra.mxu2 %v107_v26  ;;  %227 = vmatpush.msrb.mxu0 %v220_v58  ;;  %v249_v22 = vld [vmem:[#allocation2 + $0x1c0] sm:$0xff] }
  0x1b   :  { %88 = vmatpush.msra.mxu1 %v65_v13  ;;  %263 = vmatpush.msrb.mxu3 %v260_v11  ;;  %v258_v13 = vld [vmem:[#allocation2 + $0x208] sm:$0xff]  ;;  %v299_v24 = vld [vmem:[%s392_s2 + $0x3] ss:$0 sm:$0xff] }
  0x1c   :  { %125 = vmatpush.msra.mxu2 %v106_v27  ;;  %228 = vmatpush.msrb.mxu0 %v219_v59 }
  0x1d   :  { %89 = vmatpush.msra.mxu1 %v64_v14  ;;  %264 = vmatpush.msrb.mxu3 %v259_v12  ;;  %v257_v14 = vld [vmem:[#allocation2 + $0x200] sm:$0xff] }
  0x1e   :  { %126 = vmatpush.msra.mxu2 %v105_v28  ;;  %229 = vmatpush.msrb.mxu0 %v218_v60 }
  0x1f   :  { %90 = vmatpush.msra.mxu1 %v63_v15  ;;  %265 = vmatpush.msrb.mxu3 %v258_v13  ;;  %v256_v15 = vld [vmem:[#allocation2 + $0x1f8] sm:$0xff] }
  0x20   :  { %127 = vmatpush.msra.mxu2 %v104_v29  ;;  %230 = vmatpush.msrb.mxu0 %v217_v61  ;;  %v248_v29 = vld [vmem:[#allocation2 + $0x1b8] sm:$0xff] }
  0x21   :  { %91 = vmatpush.msra.mxu1 %v62_v16  ;;  %266 = vmatpush.msrb.mxu3 %v257_v14  ;;  %v255_v16 = vld [vmem:[#allocation2 + $0x1f0] sm:$0xff] }
  0x22   :  { %128 = vmatpush.msra.mxu2 %v103_v30  ;;  %231 = vmatpush.msrb.mxu0 %v216_v62  ;;  %v247_v30 = vld [vmem:[#allocation2 + $0x1b0] sm:$0xff] }
  0x23   :  { %92 = vmatpush.msra.mxu1 %v61_v17  ;;  %267 = vmatpush.msrb.mxu3 %v256_v15  ;;  %v254_v17 = vld [vmem:[#allocation2 + $0x1e8] sm:$0xff] }
  0x24   :  { %129 = vmatpush.msra.mxu2 %v102_v31  ;;  %232 = vmatpush.msrb.mxu0 %v215_v63  ;;  %v246_v31 = vld [vmem:[#allocation2 + $0x1a8] sm:$0xff] }
  0x25   :  { %93 = vmatpush.msra.mxu1 %v60_v18  ;;  %268 = vmatpush.msrb.mxu3 %v255_v16  ;;  %v253_v18 = vld [vmem:[#allocation2 + $0x1e0] sm:$0xff] }
  0x26   :  { %130 = vmatpush.msra.mxu2 %v101_v36  ;;  %233 = vmatpush.msrb.mxu0 %v214_v0 }
  0x27   :  { %178 = vmatpush.msrb.mxu1 %v158_v52  ;;  %269 = vmatpush.msrb.mxu3 %v254_v17 }
  0x28   :  { %131 = vmatpush.msra.mxu2 %v100_v37  ;;  %234 = vmatpush.msrb.mxu0 %v213_v1 }
  0x29   :  { %270 = vmatpush.msrb.mxu3 %v253_v18 }
  0x2a   :  { %132 = vmatpush.msra.mxu2 %v99_v38 }
  0x2b   :  { %271 = vmatpush.msrb.mxu3 %v252_v19 }
  0x2d   :  { %272 = vmatpush.msrb.mxu3 %v251_v20 }
  0x2f   :  { %273 = vmatpush.msrb.mxu3 %v250_v21 }
  0x31   :  { %274 = vmatpush.msrb.mxu3 %v249_v22 }
  0x33   :  { %275 = vmatpush.msrb.mxu3 %v248_v29 }
  0x35   :  { %276 = vmatpush.msrb.mxu3 %v247_v30 }
  0x37   :  { %277 = vmatpush.msrb.mxu3 %v246_v31 }
  0x86   :  { %v56_v33 = vpop.f32.mrf.mxu0 }
  0x87   :  { %v57_v34 = vadd.f32 %v296_v32, %v56_v33  ;;  %v300_v32 = vld [vmem:[%s392_s2 + $0x4] ss:$0 sm:$0xff] }
  0x89   :  { %v59_v35 = vmax.f32 %v57_v34, 0.0 }
  0x8b   :  { %94 = vmatmul.f32.vlgmr.msra.gmra.mxu1 %v59_v35 }
  0x98   :  { %v200_v23 = vpop.f32.mrf.mxu3 }
 0x108   :  { %v95_v40 = vpop.f32.mrf.mxu1 }
 0x109   :  { %v96_v41 = vadd.f32 %v297_v39, %v95_v40 }
 0x10b   :  { %v98_v42 = vmax.f32 %v96_v41, 0.0 }
 0x10d   :  { %133 = vmatmul.f32.vlgmr.msra.gmra.mxu2 %v98_v42 }
 0x190   :  { %v134_v44 = vpop.f32.mrf.mxu2 }
 0x191   :  { %v373_v45 = vadd.f32 %v298_v43, %v134_v44 }
 0x193   :  { %v137_v46 = vmul.f32 0.5, %v373_v45 }
 0x195   :  { %v138_v47 = vmul.f32 1.442695, %v137_v46 }
 0x197   :  { %301 = vpow2.f32 %v138_v47 }
 0x19d   :  { %v302_v48 = vpop.eup %301 }
 0x19e   :  { %141 = vrot.lane.b32.xlu0 %v302_v48, %s332_s25 }
 0x210   :  { %v142_v49 = vpop.permute.xlu0 %141 }
 0x211   :  { %v144_v50 = vmul.f32 %v142_v49, %v360_v2  ;;  %v212_v2 = vld [vmem:[#allocation2 + $0x150] sm:$0xff] }
 0x212   :  { %235 = vmatpush.msrb.mxu0 %v212_v2 }
 0x213   :  { %146 = vrot.lane.b32.xlu0 %v144_v50, %s333_s26 }
 0x214   :  { %236 = vmatpush.msrb.mxu0 %v211_v3 }
 0x216   :  { %237 = vmatpush.msrb.mxu0 %v210_v6 }
 0x218   :  { %238 = vmatpush.msrb.mxu0 %v209_v7 }
 0x21a   :  { %239 = vmatpush.msrb.mxu0 %v208_v8 }
 0x21c   :  { %240 = vmatpush.msrb.mxu0 %v207_v9 }
 0x285   :  { %v147_v54 = vpop.permute.xlu0 %146 }
 0x286   :  { %v149_v55 = vadd.f32 %v147_v54, %v373_v45 }
 0x288   :  { %151 = vrot.lane.b32.xlu1 %v149_v55, %s333_s26 }
 0x2fa   :  { %v152_v4 = vpop.permute.xlu1 %151 }
 0x2fb   :  { %v155_v5 = vsel %vm154_vm1, %v152_v4, 0.0 }
 0x2fc   :  { %289 = vmatmul.msk.f32.vlgmr.msrb.gmra.mxu1 %vm159_vm2, %v155_v5 }
 0x379   :  { %v180_v25 = vpop.f32.mrf.mxu1 }
 0x37a   :  { %v201_v26 = vadd.f32 %v200_v23, %v180_v25 }
 0x37c   :  { %v205_v27 = vadd.f32 %v299_v24, %v201_v26 }
 0x37e   :  { %v206_v28 = vmax.f32 %v205_v27, 0.0 }
 0x380   :  { %241 = vmatmul.f32.vlgmr.msrb.gmra.mxu0 %v206_v28 }
 0x3fd   :  { %v242_v33 = vpop.f32.mrf.mxu0 }
 0x3fe   :  { %v243_v34 = vadd.f32 %v300_v32, %v242_v33 }
 0x400   :  { %v245_v35 = vmax.f32 %v243_v34, 0.0 }
 0x402   :  { %278 = vmatmul.f32.vlgmr.msrb.gmra.mxu3 %v245_v35 }
 0x485   :  { %v279_v36 = vpop.f32.mrf.mxu3 }
 0x486   :  { %v280_v37 = vadd.f32 %v279_v36, %v373_v45 }
 0x488   :  { %282 = vst [vmem:[%s393_s3] sm:$0xff] %v280_v37 }
 0x489   :  { %287 = vsyncpa [#allocation3], 1 }

</bundles_post_ra>
